<compile_context>
chip_gen: v5e
topology: v5e:2x2
jax: 0.10.0
libtpu: 0.0.40
codegen_flags: <defaults>
</compile_context>

<pallas_src>
import jax
import jax.numpy as jnp
from jax.experimental import pallas as pl
from jax.experimental.pallas import tpu as pltpu


def _cdiv(a: int, b: int) -> int:
    return -(-a // b)


def _round_up(a: int, m: int) -> int:
    return _cdiv(a, m) * m


def _pick_tile(dim: int, cap: int, align: int):
    """Pick (tile, padded_dim) minimizing padding waste.

    If `dim` fits under `cap`, use the full unpadded extent as one block
    (block dim == full array dim is always legal). Otherwise split into
    cdiv(dim, cap) blocks and round the per-block size up to `align`.
    `cap` must be a multiple of `align` so the tile never exceeds it.
    """
    if dim <= cap:
        return dim, dim
    nb = _cdiv(dim, cap)
    tile = _round_up(_cdiv(dim, nb), align)
    return tile, tile * nb


def _linear_plus_one_kernel(x_ref, w_ref, b_ref, o_ref):
    # Grid = (parallel, parallel, K); K (reduction) is the trailing axis.
    k = pl.program_id(2)

    @pl.when(k == 0)
    def _init():
        # Output block is f32 and VMEM-resident across k -> use it as the
        # accumulator directly (no separate scratch, no extra copy/store).
        o_ref[...] = jnp.zeros_like(o_ref)

    o_ref[...] += jnp.dot(
        x_ref[...], w_ref[...], preferred_element_type=jnp.float32
    )

    @pl.when(k == pl.num_programs(2) - 1)
    def _epilogue():
        # Fused bias + 1.0, single read-modify-write of the resident block.
        o_ref[...] += b_ref[...] + 1.0


def linear_plus_one(x, w, b, *, tm_max=512, tn_max=512, tk_max=512,
                    compute_dtype=None):
    """Computes x @ w + b + 1 with a tiled Pallas TPU kernel.

    x: (N, K), w: (K, M), b: (M,) or (1, M). Output is float32.
    compute_dtype=jnp.bfloat16 optionally casts x/w for full-rate MXU on
    v6e/v7x (accumulation and epilogue stay f32).
    """
    N, K = x.shape
    Kw, M = w.shape
    assert Kw == K, (x.shape, w.shape)
    b = jnp.reshape(b, (1, M)).astype(jnp.float32)

    out_dtype = jnp.float32  # required for accumulating directly into o_ref
    if compute_dtype is not None:
        x = x.astype(compute_dtype)
        w = w.astype(compute_dtype)

    # Sublane alignment for the row dim (16 if bf16-packed), lane alignment
    # (128) for K and M.
    sub_align = 16 if compute_dtype == jnp.bfloat16 else 8
    tm_max = _round_up(tm_max, sub_align)
    tn_max = _round_up(tn_max, 128)
    tk_max = _round_up(tk_max, 128)

    tm, Np = _pick_tile(N, tm_max, sub_align)
    tk, Kp = _pick_tile(K, tk_max, 128)
    tn, Mp = _pick_tile(M, tn_max, 128)

    # Pad only the dims that actually need it (zero padding is exact for the
    # contraction; padded output rows/cols are sliced away below).
    xp = x if (Np, Kp) == (N, K) else jnp.pad(x, ((0, Np - N), (0, Kp - K)))
    wp = w if (Kp, Mp) == (K, M) else jnp.pad(w, ((0, Kp - K), (0, Mp - M)))
    bp = b if Mp == M else jnp.pad(b, ((0, 0), (0, Mp - M)))

    gr, gc, gk = Np // tm, Mp // tn, Kp // tk

    # Megacore (v7x): put the parallel axis with more blocks first so the two
    # TensorCores split the work evenly; no effect on v5e/v6e (1 TC).
    if gc > gr:
        grid = (gc, gr, gk)
        x_map = lambda j, i, k: (i, k)
        w_map = lambda j, i, k: (k, j)
        b_map = lambda j, i, k: (0, j)
        o_map = lambda j, i, k: (i, j)
    else:
        grid = (gr, gc, gk)
        x_map = lambda i, j, k: (i, k)
        w_map = lambda i, j, k: (k, j)
        b_map = lambda i, j, k: (0, j)
        o_map = lambda i, j, k: (i, j)

    elt = jnp.dtype(xp.dtype).itemsize
    # HBM traffic actually issued: x streamed once per column-tile, w once per
    # row-tile, output written once.
    bytes_accessed = elt * (Np * Kp * gc + Kp * Mp * gr) + 4 * Np * Mp

    # Double-buffered VMEM footprint (inputs + bias + output block). Only
    # raise the scoped limit when the default (16 MiB on v5e) is too small.
    vmem_need = 2 * (elt * (tm * tk + tk * tn) + 4 * (tm * tn + tn))
    cp_kwargs = {}
    if vmem_need > (12 << 20):
        cp_kwargs["vmem_limit_bytes"] = min(int(vmem_need * 1.5) + (2 << 20),
                                            96 << 20)

    out_padded = pl.pallas_call(
        _linear_plus_one_kernel,
        out_shape=jax.ShapeDtypeStruct((Np, Mp), out_dtype),
        grid_spec=pltpu.PrefetchScalarGridSpec(
            num_scalar_prefetch=0,
            grid=grid,
            in_specs=[
                pl.BlockSpec((tm, tk), x_map),   # x tile
                pl.BlockSpec((tk, tn), w_map),   # w tile
                pl.BlockSpec((1, tn), b_map),    # bias tile
            ],
            # Same (i, j) block for every k => output block stays VMEM-resident
            # across the reduction and doubles as the accumulator.
            out_specs=pl.BlockSpec((tm, tn), o_map),
        ),
        compiler_params=pltpu.CompilerParams(
            dimension_semantics=("parallel", "parallel", "arbitrary"),
            **cp_kwargs,
        ),
        cost_estimate=pl.CostEstimate(
            flops=2 * Np * Kp * Mp,
            transcendentals=0,
            bytes_accessed=bytes_accessed,
        ),
    )(xp, wp, bp)

    if (Np, Mp) != (N, M):
        out_padded = out_padded[:N, :M]
    return out_padded


def _reference(x, w, b):
    return jnp.dot(x, w, precision=jax.lax.Precision.HIGHEST) \
        + jnp.reshape(b, (1, -1)) + 1.0


if __name__ == "__main__":
    key = jax.random.PRNGKey(0)
    kx, kw, kb = jax.random.split(key, 3)

    # Shapes implied by the PyTorch module: x1 = randn(10, 5), Linear(5, 3).
    N, K, M = 10, 5, 3
    x = jax.random.normal(kx, (N, K), dtype=jnp.float32)
    bound = 1.0 / jnp.sqrt(K)
    w = jax.random.uniform(kw, (K, M), minval=-bound, maxval=bound,
                           dtype=jnp.float32)
    b = jax.random.uniform(kb, (M,), minval=-bound, maxval=bound,
                           dtype=jnp.float32)

    out = linear_plus_one(x, w, b)
    jax.block_until_ready(out)

    ref = _reference(x, w, b)
    assert out.shape == (N, M)
    # Loose-ish tolerance: MXU f32 matmul may decompose into bf16 passes.
    assert jnp.allclose(out, ref, atol=2e-2, rtol=2e-2), \
        float(jnp.max(jnp.abs(out - ref)))

    # Secondary sanity check exercising the tiled / padded path (awkward sizes,
    # small tile caps => grid=(3,2,3) with K-accumulation into o_ref).
    N2, K2, M2 = 272, 320, 200
    k2x, k2w, k2b = jax.random.split(jax.random.PRNGKey(1), 3)
    x2 = jax.random.normal(k2x, (N2, K2), dtype=jnp.float32)
    w2 = jax.random.normal(k2w, (K2, M2), dtype=jnp.float32) * 0.05
    b2 = jax.random.normal(k2b, (M2,), dtype=jnp.float32)
    out2 = linear_plus_one(x2, w2, b2, tm_max=128, tn_max=128, tk_max=128)
    jax.block_until_ready(out2)
    ref2 = _reference(x2, w2, b2)
    assert out2.shape == (N2, M2)
    assert jnp.allclose(out2, ref2, atol=2e-2, rtol=2e-2), \
        float(jnp.max(jnp.abs(out2 - ref2)))

    print("KERNEL_OK")
</pallas_src>

<mosaic_0001>
module attributes {stable_mosaic.version = 11 : i64} {
  func.func @_linear_plus_one_kernel(%arg0: i32, %arg1: i32, %arg2: i32, %arg3: memref<10x5xf32, #tpu.memory_space<vmem>>, %arg4: memref<5x3xf32, #tpu.memory_space<vmem>>, %arg5: memref<1x3xf32, #tpu.memory_space<vmem>>, %arg6: memref<10x3xf32, #tpu.memory_space<vmem>>) attributes {dimension_semantics = [#tpu.dimension_semantics<parallel>, #tpu.dimension_semantics<parallel>, #tpu.dimension_semantics<arbitrary>], iteration_bounds = array<i64: 1, 1, 1>, scalar_prefetch = 0 : i64, scratch_operands = 0 : i64, tpu.core_type = #tpu.core_type<tc>, window_params = [{transform_indices = @transform_0, window_bounds = array<i64: 10, 5>}, {transform_indices = @transform_1, window_bounds = array<i64: 5, 3>}, {transform_indices = @transform_2, window_bounds = array<i64: 1, 3>}, {transform_indices = @transform_3, window_bounds = array<i64: 10, 3>}]} {
    %c0_i32 = arith.constant 0 : i32
    %0 = arith.cmpi eq, %arg2, %c0_i32 : i32
    %1 = arith.extui %0 : i1 to i32
    %c0_i32_0 = arith.constant 0 : i32
    %2 = arith.cmpi ne, %1, %c0_i32_0 : i32
    scf.if %2 {
      %cst_10 = arith.constant 0.000000e+00 : f32
      %12 = vector.broadcast %cst_10 : f32 to vector<10x3xf32>
      %c0_11 = arith.constant 0 : index
      %c0_12 = arith.constant 0 : index
      %13 = vector.load %arg6[%c0_11, %c0_12] : memref<10x3xf32, #tpu.memory_space<vmem>>, vector<10x3xf32>
      tpu.vector_store %arg6[%c0_11, %c0_12], %12 {strides = array<i32>} : memref<10x3xf32, #tpu.memory_space<vmem>>, vector<10x3xf32>,
    } else {
    }
    %c0 = arith.constant 0 : index
    %c0_1 = arith.constant 0 : index
    %3 = vector.load %arg6[%c0, %c0_1] : memref<10x3xf32, #tpu.memory_space<vmem>>, vector<10x3xf32>
    %c0_2 = arith.constant 0 : index
    %c0_3 = arith.constant 0 : index
    %4 = vector.load %arg3[%c0_2, %c0_3] : memref<10x5xf32, #tpu.memory_space<vmem>>, vector<10x5xf32>
    %c0_4 = arith.constant 0 : index
    %c0_5 = arith.constant 0 : index
    %5 = vector.load %arg4[%c0_4, %c0_5] : memref<5x3xf32, #tpu.memory_space<vmem>>, vector<5x3xf32>
    %cst = arith.constant dense<0.000000e+00> : vector<10x3xf32>
    %6 = tpu.matmul %4, %5, %cst {dimension_numbers = #tpu.dot_dimension_numbers<[1], [0], [0], [1], [0, 0, 1, 1], [], []>} : vector<10x5xf32>, vector<5x3xf32>, vector<10x3xf32> -> vector<10x3xf32>
    %7 = arith.addf %3, %6 : vector<10x3xf32>
    %c0_6 = arith.constant 0 : index
    %c0_7 = arith.constant 0 : index
    %8 = vector.load %arg6[%c0_6, %c0_7] : memref<10x3xf32, #tpu.memory_space<vmem>>, vector<10x3xf32>
    tpu.vector_store %arg6[%c0_6, %c0_7], %7 {strides = array<i32>} : memref<10x3xf32, #tpu.memory_space<vmem>>, vector<10x3xf32>,
    %c0_i32_8 = arith.constant 0 : i32
    %9 = arith.cmpi eq, %arg2, %c0_i32_8 : i32
    %10 = arith.extui %9 : i1 to i32
    %c0_i32_9 = arith.constant 0 : i32
    %11 = arith.cmpi ne, %10, %c0_i32_9 : i32
    scf.if %11 {
      %c0_10 = arith.constant 0 : index
      %c0_11 = arith.constant 0 : index
      %12 = vector.load %arg6[%c0_10, %c0_11] : memref<10x3xf32, #tpu.memory_space<vmem>>, vector<10x3xf32>
      %c0_12 = arith.constant 0 : index
      %c0_13 = arith.constant 0 : index
      %13 = vector.load %arg5[%c0_12, %c0_13] : memref<1x3xf32, #tpu.memory_space<vmem>>, vector<1x3xf32>
      %cst_14 = arith.constant 1.000000e+00 : f32
      %14 = vector.broadcast %cst_14 : f32 to vector<1x3xf32>
      %15 = arith.addf %13, %14 : vector<1x3xf32>
      %16 = vector.broadcast %15 : vector<1x3xf32> to vector<10x3xf32>
      %17 = arith.addf %12, %16 : vector<10x3xf32>
      %c0_15 = arith.constant 0 : index
      %c0_16 = arith.constant 0 : index
      %18 = vector.load %arg6[%c0_15, %c0_16] : memref<10x3xf32, #tpu.memory_space<vmem>>, vector<10x3xf32>
      tpu.vector_store %arg6[%c0_15, %c0_16], %17 {strides = array<i32>} : memref<10x3xf32, #tpu.memory_space<vmem>>, vector<10x3xf32>,
    } else {
    }
    return
  }
  func.func @transform_0(%arg0: i32, %arg1: i32, %arg2: i32) -> (i32, i32) {
    %c0_i32 = arith.constant 0 : i32
    return %arg0, %arg2 : i32, i32
  }
  func.func @transform_1(%arg0: i32, %arg1: i32, %arg2: i32) -> (i32, i32) {
    %c0_i32 = arith.constant 0 : i32
    return %arg2, %arg1 : i32, i32
  }
  func.func @transform_2(%arg0: i32, %arg1: i32, %arg2: i32) -> (i32, i32) {
    %c0_i32 = arith.constant 0 : i32
    %c0_i32_0 = arith.constant 0 : i32
    return %c0_i32, %arg1 : i32, i32
  }
  func.func @transform_3(%arg0: i32, %arg1: i32, %arg2: i32) -> (i32, i32) {
    %c0_i32 = arith.constant 0 : i32
    return %arg0, %arg1 : i32, i32
  }
}

</mosaic_0001>

<bundles_post_ra>
// kernel: tpu_custom_call.1
= control target key start
LH: loop header
LB: loop body
LE: loop exit
PB: predicated region body
PF: predicated region fallthrough
CT: control target
= control target key end

     0   :  { %vm34_vm0 = vcmask 1044480   ;;  %vm27_vm1 = vcmask 39936   ;;  %vm18_vm2 = vcmask 23552   ;;  %v90_v3 = vmov 0.0   ;;  %s159_s1 = inlined_call_operand.vmem [shape: f32[5,3], index: 1, kind: input, shape index: {}]   ;;  %s160_s0 = inlined_call_operand.vmem [shape: f32[10,5], index: 0, kind: input, shape index: {}]   ;;  %s161_s3 = inlined_call_operand.vmem [shape: f32[10,3], index: 3, kind: output, shape index: {}]   ;;  %s162_s2 = inlined_call_operand.vmem [shape: f32[1,3], index: 2, kind: input, shape index: {}]  }
   0x1   :  { %v26_v0 = vld [vmem:[%s159_s1] sm:$0x1f]  ;;  %v25_v2 = vld [vmem:[%s160_s0 + $0x8] sm:$0x3]  ;;  %19 = vst.msk [vmem:[%s161_s3] sm:$0xff] %vm18_vm2, %v90_v3  ;;  %vm20_vm3 = vcmask 17408  }
   0x2   :  { %v24_v1 = vld [vmem:[%s160_s0] sm:$0xff]  ;;  %85 = vmatpush.msk.msra.mxu0 %vm34_vm0, %v26_v0  ;;  %88 = vmatpush.msk.msra.mxu1 %vm34_vm0, %v26_v0  ;;  %21 = vst.msk [vmem:[%s161_s3 + $0x8] sm:$0x3] %vm20_vm3, %v90_v3 }
   0x3   :  { %86 = vmatmul.msk.f32.vlgmr.msra.gmra.mxu0 %vm27_vm1, %v24_v1  ;;  %87 = vmatmul.msk.f32.vlgmr.msra.gmra.mxu1 %vm27_vm1, %v25_v2  ;;  %v72_v7 = vld [vmem:[%s162_s2] sm:$0x1] }
   0x4   :  { %v73_v11 = vadd.f32 1.0, %v72_v7 }
   0x6   :  { %v75_v12 = vperm.slane %v73_v11, 0 }
   0x8   :  { %v22_v4 = vld [vmem:[%s161_s3] sm:$0xff] }
   0x9   :  { %v23_v5 = vld [vmem:[%s161_s3 + $0x8] sm:$0x3] }
  0x80   :  { %v55_v6 = vpop.f32.mrf.mxu0  ;;  %v58_v8 = vpop.f32.mrf.mxu1 }
  0x81   :  { %v61_v9 = vadd.f32 %v55_v6, %v22_v4  ;;  %v62_v10 = vadd.f32 %v58_v8, %v23_v5 }
  0x83   :  { %64 = vst.msk [vmem:[%s161_s3] sm:$0xff] %vm18_vm2, %v61_v9 }
  0x84   :  { %66 = vst.msk [vmem:[%s161_s3 + $0x8] sm:$0x3] %vm20_vm3, %v62_v10 }
  0x8a   :  { %v70_v13 = vld [vmem:[%s161_s3] sm:$0xff] }
  0x8b   :  { %v77_v14 = vadd.f32 %v75_v12, %v70_v13  ;;  %v71_v15 = vld [vmem:[%s161_s3 + $0x8] sm:$0x3] }
  0x8c   :  { %v78_v16 = vadd.f32 %v75_v12, %v71_v15 }
  0x8d   :  { %79 = vst.msk [vmem:[%s161_s3] sm:$0xff] %vm18_vm2, %v77_v14 }
  0x8e   :  { %80 = vst.msk [vmem:[%s161_s3 + $0x8] sm:$0x3] %vm20_vm3, %v78_v16 }

</bundles_post_ra>
